<compile_context>
chip_gen: v7x
topology: tpu7x:2x2x1
jax: 0.10.0
libtpu: 0.0.40
codegen_flags: <defaults>
</compile_context>

<pallas_src>
import jax
import jax.numpy as jnp
from jax import lax
from jax.experimental import pallas as pl
from jax.experimental.pallas import tpu as pltpu


# ----------------------------------------------------------------------------
# Fused-sequence kernel: whole recurrence inside one grid-less pallas_call.
# ----------------------------------------------------------------------------
def _lstm_seq_kernel(gx_ref, w_ht_ref, h0_ref, c0_ref, h_out_ref, c_out_ref):
    # gx_ref:    (T, B, 4)  precomputed x@w_x + b, fully VMEM-resident
    # w_ht_ref:  (4, H)     recurrent weights, transposed for VPU formulation
    # h0_ref:    (B, H)     initial hidden state
    # c0_ref:    (B, H)     initial cell state
    # h_out_ref: (T, B, H)  hidden states per step
    # c_out_ref: (T, B, H)  cell states per step
    T = gx_ref.shape[0]
    w_ht = w_ht_ref[...]  # (4, H) — hoisted load, resident for the whole loop

    def step(t, carry):
        h_prev, c_prev = carry  # each (B, H), carried in vregs across steps

        # Recurrent gate pre-activations on VPU + XLU (no MXU on the serial
        # path): (B,1,H) * (1,4,H) -> (B,4,H), lane-reduce -> (B,4).
        gh = jnp.sum(h_prev[:, None, :] * w_ht[None, :, :], axis=-1)
        gates = gh + gx_ref[t]  # (B, 4); columns = [input, cand, forget, output]

        # Two full-vector EUP passes, then cheap lane slices (no per-gate
        # 1-lane transcendental pushes).
        sig = jax.nn.sigmoid(gates)  # (B, 4)
        th = jnp.tanh(gates)         # (B, 4)
        i_t = sig[:, 0:1]
        g_t = th[:, 1:2]
        f_t = sig[:, 2:3]
        o_t = sig[:, 3:4]

        c_t = f_t * c_prev + i_t * g_t      # (B,1) broadcast over (B,H)
        h_t = o_t * jnp.tanh(c_t)

        # Direct sub-slice stores; no concat / repack before storing.
        h_out_ref[t] = h_t
        c_out_ref[t] = c_t
        return h_t, c_t

    # Fully unrolled in-kernel time loop; state stays in registers.
    lax.fori_loop(0, T, step, (h0_ref[...], c0_ref[...]), unroll=True)


def my_lstm_sequence(x_seq, h0, c0, w_h, w_x, b):
    """Run MyLSTMCell over a sequence x_seq (T, B, D) in one pallas_call.

    Returns (h_seq, c_seq), each (T, B, H) float32.
    """
    T, B, D = x_seq.shape
    H = h0.shape[-1]

    # Hoist the non-recurrent x-contribution (and bias) out of the recurrence
    # as one tall matmul over all T*B rows (plain XLA, off the serial path).
    gates_x = (x_seq.reshape(T * B, D) @ w_x + b).reshape(T, B, 4)
    w_ht = w_h.T  # (4, H) layout for the in-kernel VPU mul + lane reduction

    cost = pl.CostEstimate(
        flops=16 * T * B * H,                       # recurrent mul/reduce + cell update
        transcendentals=T * (8 * B + B * H),        # 2 packed gate passes + tanh(c_t)
        bytes_accessed=4 * (T * B * 4 + 4 * H + 2 * B * H + 2 * T * B * H),
    )

    vmem = pltpu.MemorySpace.VMEM
    h_seq, c_seq = pl.pallas_call(
        _lstm_seq_kernel,
        out_shape=(
            jax.ShapeDtypeStruct((T, B, H), jnp.float32),
            jax.ShapeDtypeStruct((T, B, H), jnp.float32),
        ),
        in_specs=[
            pl.BlockSpec(memory_space=vmem),  # gates_x (T, B, 4) — fully resident
            pl.BlockSpec(memory_space=vmem),  # w_h^T   (4, H)
            pl.BlockSpec(memory_space=vmem),  # h0      (B, H)
            pl.BlockSpec(memory_space=vmem),  # c0      (B, H)
        ],
        out_specs=(
            pl.BlockSpec(memory_space=vmem),  # h_seq (T, B, H)
            pl.BlockSpec(memory_space=vmem),  # c_seq (T, B, H)
        ),
        cost_estimate=cost,
    )(gates_x, w_ht, h0, c0)

    return h_seq, c_seq


def my_lstm_cell(x_t, h_t_1, c_t_1, w_h, w_x, b):
    """Exact MyLSTMCell.forward: one step. Thin wrapper over the fused kernel
    (no standalone per-step pallas_call — never call this in a Python loop;
    use my_lstm_sequence for sequences)."""
    h_seq, c_seq = my_lstm_sequence(x_t[None], h_t_1, c_t_1, w_h, w_x, b)
    return h_seq[0], c_seq[0]


# ----------------------------------------------------------------------------
# Params + plain-JAX references
# ----------------------------------------------------------------------------
def init_params(key, input_size, hidden_size):
    """Matches nn.Linear's U(-1/sqrt(fan_in), 1/sqrt(fan_in)); weights are the
    fused (H+D, 4) matrix of the four 1-unit Linears, split into w_h / w_x
    consistent with torch.cat([H, X], dim=-1)."""
    F = input_size + hidden_size
    bound = 1.0 / float(F) ** 0.5
    kw, kb = jax.random.split(key)
    w4 = jax.random.uniform(kw, (F, 4), jnp.float32, minval=-bound, maxval=bound)
    b4 = jax.random.uniform(kb, (1, 4), jnp.float32, minval=-bound, maxval=bound)
    w_h = w4[:hidden_size]   # (H, 4)
    w_x = w4[hidden_size:]   # (D, 4)
    return w_h, w_x, b4


def reference_step(x_t, h_prev, c_prev, w_h, w_x, b):
    gates = h_prev @ w_h + x_t @ w_x + b
    i_t = jax.nn.sigmoid(gates[:, 0:1])
    g_t = jnp.tanh(gates[:, 1:2])
    f_t = jax.nn.sigmoid(gates[:, 2:3])
    o_t = jax.nn.sigmoid(gates[:, 3:4])
    c_t = f_t * c_prev + i_t * g_t
    h_t = o_t * jnp.tanh(c_t)
    return h_t, c_t


def reference_sequence(x_seq, h0, c0, w_h, w_x, b):
    def step(carry, x_t):
        h, c = carry
        h_n, c_n = reference_step(x_t, h, c, w_h, w_x, b)
        return (h_n, c_n), (h_n, c_n)

    _, (h_seq, c_seq) = jax.lax.scan(step, (h0, c0), x_seq)
    return h_seq, c_seq


if __name__ == "__main__":
    B, D, H, T = 2, 16, 32, 8  # batch, input_size, hidden_size, sequence length

    key = jax.random.PRNGKey(0)
    k_x, k_h, k_c, k_p = jax.random.split(key, 4)

    x_seq = jax.random.normal(k_x, (T, B, D), jnp.float32)
    h0 = jax.random.normal(k_h, (B, H), jnp.float32)
    c0 = jax.random.normal(k_c, (B, H), jnp.float32)
    w_h, w_x, b = init_params(k_p, D, H)

    seq_fn = jax.jit(my_lstm_sequence)

    # --- single step (exact MyLSTMCell.forward, via the fused kernel, T=1) ---
    h_t, c_t = my_lstm_cell(x_seq[0], h0, c0, w_h, w_x, b)
    jax.block_until_ready((h_t, c_t))
    h_ref, c_ref = reference_step(x_seq[0], h0, c0, w_h, w_x, b)
    assert h_t.shape == (B, H) and c_t.shape == (B, H)
    assert jnp.allclose(h_t, h_ref, atol=1e-4, rtol=1e-4)
    assert jnp.allclose(c_t, c_ref, atol=1e-4, rtol=1e-4)

    # --- fused sequence (time loop unrolled inside one pallas_call) ---
    h_seq, c_seq = seq_fn(x_seq, h0, c0, w_h, w_x, b)
    jax.block_until_ready((h_seq, c_seq))
    h_seq_ref, c_seq_ref = reference_sequence(x_seq, h0, c0, w_h, w_x, b)
    assert h_seq.shape == (T, B, H) and c_seq.shape == (T, B, H)
    assert jnp.allclose(h_seq, h_seq_ref, atol=1e-4, rtol=1e-4)
    assert jnp.allclose(c_seq, c_seq_ref, atol=1e-4, rtol=1e-4)

    print("KERNEL_OK")
</pallas_src>

<mosaic_0001>
module attributes {stable_mosaic.version = 11 : i64} {
  func.func @_lstm_seq_kernel(%arg0: memref<1x2x4xf32, #tpu.memory_space<vmem>>, %arg1: memref<4x32xf32, #tpu.memory_space<vmem>>, %arg2: memref<2x32xf32, #tpu.memory_space<vmem>>, %arg3: memref<2x32xf32, #tpu.memory_space<vmem>>, %arg4: memref<1x2x32xf32, #tpu.memory_space<vmem>>, %arg5: memref<1x2x32xf32, #tpu.memory_space<vmem>>) attributes {dimension_semantics = [], scalar_prefetch = 0 : i64, scratch_operands = 0 : i64, tpu.core_type = #tpu.core_type<tc>} {
    %c0 = arith.constant 0 : index
    %c0_0 = arith.constant 0 : index
    %0 = vector.load %arg1[%c0, %c0_0] : memref<4x32xf32, #tpu.memory_space<vmem>>, vector<4x32xf32>
    %c0_1 = arith.constant 0 : index
    %c0_2 = arith.constant 0 : index
    %1 = vector.load %arg2[%c0_1, %c0_2] : memref<2x32xf32, #tpu.memory_space<vmem>>, vector<2x32xf32>
    %c0_3 = arith.constant 0 : index
    %c0_4 = arith.constant 0 : index
    %2 = vector.load %arg3[%c0_3, %c0_4] : memref<2x32xf32, #tpu.memory_space<vmem>>, vector<2x32xf32>
    %c0_i32 = arith.constant 0 : i32
    %3 = vector.shape_cast %1 : vector<2x32xf32> to vector<2x1x32xf32>
    %4 = vector.shape_cast %0 : vector<4x32xf32> to vector<1x4x32xf32>
    %5 = vector.broadcast %3 : vector<2x1x32xf32> to vector<2x4x32xf32>
    %6 = vector.broadcast %4 : vector<1x4x32xf32> to vector<2x4x32xf32>
    %7 = arith.mulf %5, %6 : vector<2x4x32xf32>
    %cst = arith.constant dense<0.000000e+00> : vector<2x4xf32>
    %8 = vector.multi_reduction <add>, %7, %cst [2] : vector<2x4x32xf32> to vector<2x4xf32>
    %9 = arith.index_cast %c0_i32 : i32 to index
    %c0_5 = arith.constant 0 : index
    %c0_6 = arith.constant 0 : index
    %10 = vector.load %arg0[%9, %c0_5, %c0_6] : memref<1x2x4xf32, #tpu.memory_space<vmem>>, vector<1x2x4xf32>
    %11 = vector.shape_cast %10 : vector<1x2x4xf32> to vector<2x4xf32>
    %12 = arith.addf %8, %11 : vector<2x4xf32>
    %13 = arith.negf %12 : vector<2x4xf32>
    %14 = math.exp %13 : vector<2x4xf32>
    %cst_7 = arith.constant 1.000000e+00 : f32
    %15 = vector.broadcast %cst_7 : f32 to vector<2x4xf32>
    %16 = arith.addf %15, %14 : vector<2x4xf32>
    %17 = arith.divf %15, %16 : vector<2x4xf32>
    %18 = math.tanh %12 : vector<2x4xf32>
    %19 = vector.extract_strided_slice %17 {offsets = [0, 0], sizes = [2, 1], strides = [1, 1]} : vector<2x4xf32> to vector<2x1xf32>
    %20 = vector.extract_strided_slice %18 {offsets = [0, 1], sizes = [2, 1], strides = [1, 1]} : vector<2x4xf32> to vector<2x1xf32>
    %21 = vector.extract_strided_slice %17 {offsets = [0, 2], sizes = [2, 1], strides = [1, 1]} : vector<2x4xf32> to vector<2x1xf32>
    %22 = vector.extract_strided_slice %17 {offsets = [0, 3], sizes = [2, 1], strides = [1, 1]} : vector<2x4xf32> to vector<2x1xf32>
    %23 = vector.broadcast %21 : vector<2x1xf32> to vector<2x32xf32>
    %24 = arith.mulf %23, %2 : vector<2x32xf32>
    %25 = arith.mulf %19, %20 : vector<2x1xf32>
    %26 = vector.broadcast %25 : vector<2x1xf32> to vector<2x32xf32>
    %27 = arith.addf %24, %26 : vector<2x32xf32>
    %28 = math.tanh %27 : vector<2x32xf32>
    %29 = vector.broadcast %22 : vector<2x1xf32> to vector<2x32xf32>
    %30 = arith.mulf %29, %28 : vector<2x32xf32>
    %31 = arith.index_cast %c0_i32 : i32 to index
    %c0_8 = arith.constant 0 : index
    %c0_9 = arith.constant 0 : index
    %32 = vector.load %arg4[%31, %c0_8, %c0_9] : memref<1x2x32xf32, #tpu.memory_space<vmem>>, vector<1x2x32xf32>
    %33 = vector.shape_cast %32 : vector<1x2x32xf32> to vector<2x32xf32>
    %34 = vector.shape_cast %30 : vector<2x32xf32> to vector<1x2x32xf32>
    tpu.vector_store %arg4[%31, %c0_8, %c0_9], %34 {strides = array<i32>} : memref<1x2x32xf32, #tpu.memory_space<vmem>>, vector<1x2x32xf32>,
    %35 = arith.index_cast %c0_i32 : i32 to index
    %c0_10 = arith.constant 0 : index
    %c0_11 = arith.constant 0 : index
    %36 = vector.load %arg5[%35, %c0_10, %c0_11] : memref<1x2x32xf32, #tpu.memory_space<vmem>>, vector<1x2x32xf32>
    %37 = vector.shape_cast %36 : vector<1x2x32xf32> to vector<2x32xf32>
    %38 = vector.shape_cast %27 : vector<2x32xf32> to vector<1x2x32xf32>
    tpu.vector_store %arg5[%35, %c0_10, %c0_11], %38 {strides = array<i32>} : memref<1x2x32xf32, #tpu.memory_space<vmem>>, vector<1x2x32xf32>,
    %c1_i32 = arith.constant 1 : i32
    return
  }
}

</mosaic_0001>

<bundles_post_ra>
// kernel: tpu_custom_call.1
= control target key start
LH: loop header
LB: loop body
LE: loop exit
PB: predicated region body
PF: predicated region fallthrough
CT: control target
= control target key end

     0   :  { %11 = vsyncpa [#allocation3], 0  ;;  %s683_s0 = inlined_call_operand.hbm [shape: f32[1,2,4], index: 0, kind: input, shape index: {}]   ;;  %s684_s1 = inlined_call_operand.hbm [shape: f32[4,32], index: 1, kind: input, shape index: {}]   ;;  %s685_s2 = inlined_call_operand.vmem [shape: f32[2,32], index: 2, kind: input, shape index: {}]   ;;  %s686_s3 = inlined_call_operand.vmem [shape: f32[2,32], index: 3, kind: input, shape index: {}]   ;;  %s687_s4 = inlined_call_operand.hbm [shape: f32[1,2,32], index: 4, kind: output, shape index: {0}]   ;;  %s688_s5 = inlined_call_operand.hbm [shape: f32[1,2,32], index: 5, kind: output, shape index: {1}]  }
   0x1   :  { %12 = vsyncpa [#allocation6], 0 }
   0x2   :  { %13 = vsyncpa [#allocation4], 0 }
   0x3   :  { %14 = vsyncpa [#allocation9], 0  ;;  %s556_s18 = smov [#allocation2]   ;;  %s557_s20 = smov [#allocation5]  }
   0x4   :  { %s21_s19 = sshll.u32 %s556_s18, 4  ;;  %s31_s21 = sshll.u32 %s557_s20, 4  ;;  %s22_s19 = int_to_ptr.vmem [resolvable:$true] %s21_s19  ;;  %s32_s21 = int_to_ptr.vmem [resolvable:$true] %s31_s21 }
   0x5   :  { %s460_s24 = scalar_lea.hbm %s683_s0, 32 }
   0x6   :  { %p461_p0 = scmp.ne.s32.totalorder %s683_s0, %s460_s24  ;;  %p464_p1 = scmp.lt.u32.totalorder %s460_s24, %s683_s0 }
   0x8   :  { %p466_p2 = pnand %p464_p1, %p461_p0 }
   0xa   :  { %469 = shalt.err (!%p466_p2)
}
   0xb   :  { %s470_s29 = scalar_lea.vmem %s22_s19, 32  ;;  %p475_p4 = scmp.lt.s32.totalorder %s22_s19, %s22_s19 }
   0xc   :  { %p471_p3 = scmp.ne.s32.totalorder %s22_s19, %s470_s29  ;;  %p476_p5 = scmp.lt.s32.totalorder %s470_s29, %s470_s29 }
   0xe   :  { %p477_p6 = por %p476_p5, %p475_p4 }
  0x10   :  { %p478_p7 = pnand %p477_p6, %p471_p3 }
  0x12   :  { %481 = shalt.err (!%p478_p7)
}
  0x13   :  { %24 = dma.hbm_to_vmem [thread:$0]  %s683_s0, 32, %s22_s19, [#allocation3]  }
  0x14   :  { %s482_s9 = scalar_lea.hbm %s684_s1, 64 }
  0x15   :  { %p483_p8 = scmp.ne.s32.totalorder %s684_s1, %s482_s9  ;;  %p486_p9 = scmp.lt.u32.totalorder %s482_s9, %s684_s1 }
  0x17   :  { %p488_p10 = pnand %p486_p9, %p483_p8 }
  0x19   :  { %491 = shalt.err (!%p488_p10)
}
  0x1a   :  { %s492_s14 = scalar_lea.vmem %s32_s21, 64  ;;  %p497_p12 = scmp.lt.s32.totalorder %s32_s21, %s32_s21 }
  0x1b   :  { %p493_p11 = scmp.ne.s32.totalorder %s32_s21, %s492_s14  ;;  %p498_p13 = scmp.lt.s32.totalorder %s492_s14, %s492_s14 }
  0x1d   :  { %p499_p0 = por %p498_p13, %p497_p12 }
  0x1f   :  { %p500_p1 = pnand %p499_p0, %p493_p11 }
  0x21   :  { %503 = shalt.err (!%p500_p1)
}
  0x22   :  { %34 = dma.hbm_to_vmem [thread:$0]  %s684_s1, 64, %s32_s21, [#allocation6]  }
  0x23   :  { %548 = dma.done.wait [#allocation3], 32  }
  0x24   :  { %549 = vsyncadd [#allocation3], 4294967264 }
  0x25   :  { %550 = dma.done.wait [#allocation6], 64  }
  0x26   :  { %551 = vsyncadd [#allocation6], 4294967232  ;;  %v60_v0 = vlaneseq  ;;  %v558_v1 = vmov 1966171168   ;;  %v90_v11 = vld [vmem:[#allocation2] sm:$0x3] }
  0x27   :  { %v58_v2 = vunpack.c.l.s4 %v558_v1  ;;  %v421_v7 = vld.sshfl [vmem:[%s685_s2] sm:$0x11 pattern:$0x75316420]  ;;  %v45_v12 = vld [vmem:[#allocation5] sm:$0xf] }
  0x28   :  { %v617_v3 = vshrl.u32 %v60_v0, 7  ;;  %v56_v9 = vcombine.high %v421_v7, %v421_v7  ;;  %vm83_vm0 = vcmask 257024   ;;  %v47_v19 = vld [vmem:[%s686_s3] sm:$0x3]  ;;  %v559_v25 = vmov 0   ;;  %s560_s2 = smov [#allocation7]  }
  0x29   :  { %v59_v4 = vunpack.c.0.s8 %v58_v2  ;;  %431 = vset.pattern.permute.xlu1 %v559_v25  ;;  %430 = vset.pattern.permute.xlu0 %v559_v25  ;;  %vm278_vm1 = vcmask 130112   ;;  %vm285_vm2 = vcmask 195712   ;;  %vm292_vm3 = vcmask 261312   ;;  %s397_s3 = sshll.u32 %s560_s2, 4  ;;  %s561_s19 = smov [#allocation8]   ;;  %s398_s3 = int_to_ptr.vmem [resolvable:$true] %s397_s3 }
  0x2a   :  { %v621_v6 = vsub.s32 0, %v617_v3  ;;  %v101_v8 = vsub.s32 1, %v617_v3  ;;  %v126_v44 = vsub.s32 2, %v617_v3  ;;  %vm313_vm4 = vcmask 1041409   ;;  %s407_s20 = sshll.u32 %s561_s19, 4  ;;  %s504_s21 = scalar_lea.vmem %s398_s3, 32  ;;  %s408_s20 = int_to_ptr.vmem [resolvable:$true] %s407_s20 }
  0x2b   :  { %v62_v5 = vsub.s32 %v59_v4, %v617_v3  ;;  %vm316_vm5 = vcmask 254976   ;;  %p505_p2 = scmp.ne.s32.totalorder %s398_s3, %s504_s21  ;;  %p509_p3 = scmp.lt.s32.totalorder %s398_s3, %s398_s3 }
  0x2c   :  { %v95_v13 = vrot.slane %v90_v11, %v621_v6  ;;  %v102_v16 = vrot.slane %v90_v11, %v101_v8  ;;  %v136_v22 = vrot.slane %v47_v19, %v621_v6  ;;  %v155_v24 = vrot.slane %v47_v19, %v101_v8  ;;  %p510_p4 = scmp.lt.s32.totalorder %s504_s21, %s504_s21 }
  0x2d   :  { %v63_v10 = vrot.slane %v421_v7, %v62_v5  ;;  %v70_v15 = vrot.slane %v56_v9, %v62_v5 }
  0x2e   :  { %97 = vbcast.lane.b32.xlu1 %v95_v13, 256  ;;  %p511_p5 = por %p510_p4, %p509_p3 }
  0x2f   :  { %v74_v14 = vrot.slane %v63_v10, %v621_v6  ;;  %v78_v18 = vrot.slane %v70_v15, %v621_v6  ;;  %v221_v10 = vsub.s32 3, %v617_v3 }
  0x30   :  { %p512_p6 = pnand %p511_p5, %p505_p2 }
  0x31   :  { %v81_v17 = vmul.f32 %v74_v14, %v45_v12  ;;  %v82_v21 = vmul.f32 %v78_v18, %v45_v12 }
  0x32   :  { %104 = vbcast.lane.b32.xlu1 %v102_v16, 256 }
  0x33   :  { %v84_v20 = vsel %vm83_vm0, %v81_v17, 0.0  ;;  %v87_v23 = vsel %vm83_vm0, %v82_v21, 0.0 }
  0x34   :  { %85 = vadd.xlane.f32.xlu0 %v84_v20 }
  0x36   :  { %142 = vbcast.lane.b32.xlu1 %v136_v22, 264 }
  0x38   :  { %88 = vadd.xlane.f32.xlu0 %v87_v23 }
  0x3a   :  { %157 = vbcast.lane.b32.xlu1 %v155_v24, 256 }
  0x3e   :  { %161 = vbcast.lane.b32.xlu1 %v155_v24, 264 }
  0x42   :  { %146 = vbcast.lane.b32.xlu1 %v136_v22, 272 }
  0x46   :  { %165 = vbcast.lane.b32.xlu1 %v155_v24, 272 }
  0x4a   :  { %150 = vbcast.lane.b32.xlu1 %v136_v22, 280 }
  0x4e   :  { %138 = vbcast.lane.b32.xlu0 %v136_v22, 256 }
  0x52   :  { %169 = vbcast.lane.b32.xlu0 %v155_v24, 280 }
  0xa0   :  { %v98_v26 = vpop.permute.xlu1 %97 }
  0xa4   :  { %v105_v27 = vpop.permute.xlu1 %104 }
  0xa8   :  { %v143_v28 = vpop.permute.xlu1 %142 }
  0xac   :  { %v158_v34 = vpop.permute.xlu1 %157 }
  0xb0   :  { %v162_v36 = vpop.permute.xlu1 %161 }
  0xb4   :  { %v147_v39 = vpop.permute.xlu1 %146 }
  0xb8   :  { %v166_v42 = vpop.permute.xlu1 %165 }
  0xbc   :  { %v151_v50 = vpop.permute.xlu1 %150 }
  0xc1   :  { %v86_v29 = vpop.xlane.xlu0 %85 }
  0xc2   :  { %v108_v30 = vadd.f32 %v98_v26, %v86_v29 }
  0xc4   :  { %v422_v31 = vmul.f32 -1.442695, %v108_v30 }
  0xc5   :  { %v89_v32 = vpop.xlane.xlu0 %88 }
  0xc6   :  { %432 = vpow2.f32 %v422_v31  ;;  %v109_v33 = vadd.f32 %v105_v27, %v89_v32 }
  0xc8   :  { %v423_v35 = vmul.f32 -1.442695, %v109_v33 }
  0xc9   :  { %v139_v51 = vpop.permute.xlu0 %138 }
  0xca   :  { %434 = vpow2.f32 %v423_v35 }
  0xcb   :  { %436 = vtanh.f32 %v108_v30 }
  0xcc   :  { %438 = vtanh.f32 %v109_v33 }
  0xcd   :  { %v170_v12 = vpop.permute.xlu0 %169 }
  0xd0   :  { %v433_v37 = vpop.eup %432 }
  0xd1   :  { %v116_v38 = vadd.f32 1.0, %v433_v37 }
  0xd3   :  { %440 = vrcp.f32 %v116_v38 }
  0xd4   :  { %v435_v40 = vpop.eup %434 }
  0xd5   :  { %v117_v41 = vadd.f32 1.0, %v435_v40  ;;  %v437_v43 = vpop.eup %436  ;;  %v268_v40 = vand.u32 127, %v60_v0 }
  0xd6   :  { %v439_v45 = vpop.eup %438  ;;  %v189_v46 = vrot.slane %v437_v43, 1 }
  0xd7   :  { %442 = vrcp.f32 %v117_v41  ;;  %v190_v53 = vrot.slane %v439_v45, 1  ;;  %v273_v43 = vadd.s32 4294967288, %v268_v40  ;;  %v280_v45 = vadd.s32 4294967280, %v268_v40 }
  0xdd   :  { %v441_v47 = vpop.eup %440 }
  0xde   :  { %v193_v48 = vmul.f32 %v441_v47, %v189_v46  ;;  %v127_v49 = vrot.slane %v441_v47, %v126_v44  ;;  %v222_v13 = vrot.slane %v441_v47, %v221_v10 }
  0xe0   :  { %v198_v52 = vrot.slane %v193_v48, %v621_v6  ;;  %v180_v54 = vmul.f32 %v143_v28, %v127_v49  ;;  %v181_v55 = vmul.f32 %v147_v39, %v127_v49  ;;  %v182_v57 = vmul.f32 %v151_v50, %v127_v49 }
  0xe1   :  { %v443_v56 = vpop.eup %442  ;;  %v179_v58 = vmul.f32 %v139_v51, %v127_v49  ;;  %v276_v48 = vsub.s32 %v273_v43, %v617_v3  ;;  %v271_v49 = vsub.s32 %v268_v40, %v617_v3  ;;  %v283_v51 = vsub.s32 %v280_v45, %v617_v3 }
  0xe2   :  { %v194_v59 = vmul.f32 %v443_v56, %v190_v53  ;;  %v204_v60 = vadd.f32 %v198_v52, %v180_v54  ;;  %v131_v61 = vrot.slane %v443_v56, %v126_v44  ;;  %v205_v62 = vadd.f32 %v198_v52, %v181_v55 }
  0xe3   :  { %v203_v63 = vadd.f32 %v198_v52, %v179_v58  ;;  %v206_v5 = vadd.f32 %v198_v52, %v182_v57  ;;  %v226_v21 = vrot.slane %v443_v56, %v221_v10  ;;  %v287_v44 = vadd.s32 4294967272, %v268_v40 }
  0xe4   :  { %v202_v1 = vrot.slane %v194_v59, %v621_v6  ;;  %444 = vtanh.f32 %v204_v60  ;;  %v183_v2 = vmul.f32 %v158_v34, %v131_v61  ;;  %v184_v4 = vmul.f32 %v162_v36, %v131_v61  ;;  %330 = vperm.xlu1 %431, %v204_v60  }
  0xe5   :  { %327 = vperm.xlu0 %430, %v203_v63   ;;  %446 = vtanh.f32 %v205_v62  ;;  %v185_v9 = vmul.f32 %v166_v42, %v131_v61  ;;  %v186_v6 = vmul.f32 %v170_v12, %v131_v61  ;;  %v290_v50 = vsub.s32 %v287_v44, %v617_v3 }
  0xe6   :  { %v207_v7 = vadd.f32 %v202_v1, %v183_v2  ;;  %v208_v8 = vadd.f32 %v202_v1, %v184_v4  ;;  %448 = vtanh.f32 %v203_v63 }
  0xe7   :  { %v209_v11 = vadd.f32 %v202_v1, %v185_v9  ;;  %v210_v18 = vadd.f32 %v202_v1, %v186_v6 }
  0xe8   :  { %450 = vtanh.f32 %v207_v7  ;;  %342 = vperm.xlu1 %431, %v208_v8  }
  0xe9   :  { %333 = vperm.xlu0 %430, %v205_v62   ;;  %452 = vtanh.f32 %v206_v5 }
  0xea   :  { %454 = vtanh.f32 %v208_v8 }
  0xeb   :  { %456 = vtanh.f32 %v209_v11 }
  0xec   :  { %345 = vperm.xlu1 %431, %v209_v11   ;;  %458 = vtanh.f32 %v210_v18 }
  0xed   :  { %339 = vperm.xlu0 %430, %v207_v7  }
  0xee   :  { %v445_v14 = vpop.eup %444 }
  0xef   :  { %v228_v15 = vmul.f32 %v445_v14, %v222_v13  ;;  %v447_v16 = vpop.eup %446 }
  0xf0   :  { %v449_v17 = vpop.eup %448  ;;  %v229_v22 = vmul.f32 %v447_v16, %v222_v13 }
  0xf1   :  { %247 = vperm.xlu0 %430, %v228_v15   ;;  %v227_v20 = vmul.f32 %v449_v17, %v222_v13 }
  0xf2   :  { %v451_v19 = vpop.eup %450 }
  0xf3   :  { %v453_v23 = vpop.eup %452  ;;  %244 = vperm.xlu1 %431, %v227_v20   ;;  %v231_v24 = vmul.f32 %v451_v19, %v226_v21 }
  0xf4   :  { %v455_v25 = vpop.eup %454  ;;  %v230_v26 = vmul.f32 %v453_v23, %v222_v13 }
  0xf5   :  { %250 = vperm.xlu0 %430, %v229_v22   ;;  %v232_v27 = vmul.f32 %v455_v25, %v226_v21  ;;  %v457_v28 = vpop.eup %456 }
  0xf6   :  { %v233_v29 = vmul.f32 %v457_v28, %v226_v21  ;;  %v459_v30 = vpop.eup %458 }
  0xf7   :  { %256 = vperm.xlu1 %431, %v231_v24   ;;  %v234_v31 = vmul.f32 %v459_v30, %v226_v21 }
  0xf9   :  { %253 = vperm.xlu0 %430, %v230_v26  }
  0xfb   :  { %259 = vperm.xlu1 %431, %v232_v27  }
  0xfd   :  { %336 = vperm.xlu0 %430, %v206_v5  }
  0xff   :  { %262 = vperm.xlu1 %431, %v233_v29  }
 0x103   :  { %265 = vperm.xlu1 %431, %v234_v31  }
 0x107   :  { %348 = vperm.xlu1 %431, %v210_v18  }
 0x163   :  { %v331_v32 = vpop.permute.xlu1 %330 }
 0x164   :  { %v328_v33 = vpop.permute.xlu0 %327  ;;  %v357_v60 = vrot.slane %v331_v32, %v276_v48 }
 0x165   :  { %v353_v61 = vrot.slane %v328_v33, %v271_v49 }
 0x167   :  { %v343_v34 = vpop.permute.xlu1 %342  ;;  %v358_v15 = vsel %vm278_vm1, %v357_v60, %v353_v61 }
 0x168   :  { %v334_v35 = vpop.permute.xlu0 %333  ;;  %v376_v3 = vrot.slane %v343_v34, %v276_v48 }
 0x169   :  { %v362_v5 = vrot.slane %v334_v35, %v283_v51 }
 0x16b   :  { %v346_v37 = vpop.permute.xlu1 %345  ;;  %v363_v17 = vsel %vm285_vm2, %v362_v5, %v358_v15 }
 0x16c   :  { %v340_v36 = vpop.permute.xlu0 %339  ;;  %v381_v7 = vrot.slane %v346_v37, %v283_v51 }
 0x16d   :  { %v372_v57 = vrot.slane %v340_v36, %v271_v49 }
 0x16f   :  { %v377_v10 = vsel %vm278_vm1, %v376_v3, %v372_v57 }
 0x170   :  { %v248_v38 = vpop.permute.xlu0 %247  ;;  %v382_v18 = vsel %vm285_vm2, %v381_v7, %v377_v10 }
 0x171   :  { %v277_v54 = vrot.slane %v248_v38, %v276_v48 }
 0x172   :  { %v245_v39 = vpop.permute.xlu1 %244 }
 0x173   :  { %v272_v53 = vrot.slane %v245_v39, %v271_v49 }
 0x174   :  { %v251_v42 = vpop.permute.xlu0 %250 }
 0x175   :  { %v284_v0 = vrot.slane %v251_v42, %v283_v51  ;;  %v279_v1 = vsel %vm278_vm1, %v277_v54, %v272_v53 }
 0x176   :  { %v257_v41 = vpop.permute.xlu1 %256 }
 0x177   :  { %v297_v58 = vrot.slane %v257_v41, %v271_v49  ;;  %v286_v8 = vsel %vm285_vm2, %v284_v0, %v279_v1 }
 0x178   :  { %v254_v47 = vpop.permute.xlu0 %253 }
 0x179   :  { %v291_v59 = vrot.slane %v254_v47, %v290_v50 }
 0x17a   :  { %v260_v46 = vpop.permute.xlu1 %259 }
 0x17b   :  { %v301_v55 = vrot.slane %v260_v46, %v276_v48  ;;  %v293_v11 = vsel %vm292_vm3, %v291_v59, %v286_v8 }
 0x17c   :  { %v337_v62 = vpop.permute.xlu0 %336 }
 0x17d   :  { %v302_v2 = vsel %vm278_vm1, %v301_v55, %v297_v58  ;;  %v367_v12 = vrot.slane %v337_v62, %v290_v50 }
 0x17e   :  { %v263_v52 = vpop.permute.xlu1 %262 }
 0x17f   :  { %v306_v56 = vrot.slane %v263_v52, %v283_v51 }
 0x181   :  { %v307_v9 = vsel %vm285_vm2, %v306_v56, %v302_v2 }
 0x182   :  { %v266_v63 = vpop.permute.xlu1 %265 }
 0x183   :  { %v311_v4 = vrot.slane %v266_v63, %v290_v50 }
 0x185   :  { %v312_v6 = vsel %vm292_vm3, %v311_v4, %v307_v9 }
 0x186   :  { %v349_v13 = vpop.permute.xlu1 %348  ;;  %v314_v14 = vsel %vm313_vm4, %v312_v6, %v293_v11 }
 0x187   :  { %v386_v16 = vrot.slane %v349_v13, %v290_v50  ;;  %317 = vst.msk [vmem:[#allocation7] sm:$0x3] %vm316_vm5, %v314_v14 }
 0x188   :  { %515 = shalt.err (!%p512_p6)
}
 0x189   :  { %s516_s24 = scalar_lea.hbm %s687_s4, 32 }
 0x18a   :  { %p517_p7 = scmp.ne.s32.totalorder %s687_s4, %s516_s24  ;;  %p520_p8 = scmp.lt.u32.totalorder %s516_s24, %s687_s4 }
 0x18c   :  { %p522_p9 = pnand %p520_p8, %p517_p7 }
 0x18e   :  { %525 = shalt.err (!%p522_p9)
}
 0x18f   :  { %400 = dma.vmem_to_hbm [thread:$0]  %s398_s3, 32, %s687_s4, [#allocation4]   ;;  %v368_v19 = vsel %vm292_vm3, %v367_v12, %v363_v17  ;;  %v387_v20 = vsel %vm292_vm3, %v386_v16, %v382_v18 }
 0x190   :  { %v388_v21 = vsel %vm313_vm4, %v387_v20, %v368_v19  ;;  %s526_s6 = scalar_lea.vmem %s408_s20, 32  ;;  %p531_p11 = scmp.lt.s32.totalorder %s408_s20, %s408_s20 }
 0x191   :  { %390 = vst.msk [vmem:[#allocation8] sm:$0x3] %vm316_vm5, %v388_v21  ;;  %p527_p10 = scmp.ne.s32.totalorder %s408_s20, %s526_s6  ;;  %p532_p12 = scmp.lt.s32.totalorder %s526_s6, %s526_s6 }
 0x193   :  { %p533_p13 = por %p532_p12, %p531_p11 }
 0x195   :  { %p534_p0 = pnand %p533_p13, %p527_p10 }
 0x197   :  { %537 = shalt.err (!%p534_p0)
}
 0x198   :  { %s538_s4 = scalar_lea.hbm %s688_s5, 32 }
 0x199   :  { %p539_p1 = scmp.ne.s32.totalorder %s688_s5, %s538_s4  ;;  %p542_p2 = scmp.lt.u32.totalorder %s538_s4, %s688_s5 }
 0x19b   :  { %p544_p3 = pnand %p542_p2, %p539_p1 }
 0x19d   :  { %547 = shalt.err (!%p544_p3)
}
 0x19e   :  { %410 = dma.vmem_to_hbm [thread:$0]  %s408_s20, 32, %s688_s5, [#allocation9]  }
 0x19f   :  { %552 = dma.done.wait [#allocation4], 32  }
 0x1a0   :  { %553 = vsyncadd [#allocation4], 4294967264 }
 0x1a1   :  { %554 = dma.done.wait [#allocation9], 32  }
 0x1a2   :  { %555 = vsyncadd [#allocation9], 4294967264 }
 0x1a3   :  { %417 = vsyncpa [#allocation3], 1 }
 0x1a4   :  { %418 = vsyncpa [#allocation6], 1 }
 0x1a5   :  { %419 = vsyncpa [#allocation4], 1 }
 0x1a6   :  { %420 = vsyncpa [#allocation9], 1 }

</bundles_post_ra>
